<compile_context>
chip_gen: v7x
topology: tpu7x:2x2x1
jax: 0.10.0
libtpu: 0.0.40
codegen_flags: <defaults>
</compile_context>

<pallas_src>
import math

import jax
import jax.numpy as jnp
from jax.experimental import pallas as pl
from jax.experimental.pallas import tpu as pltpu


def _round_up(v, m):
    return ((v + m - 1) // m) * m


def gat_kernel(esrc_ref, edst_ref, adj_ref, h_ref, o_ref):
    """One (batch-tile, query-tile) step: mask -> softmax -> aggregate.

    esrc_ref: (TB, TQ, 1)       per-query-node logit scalar   (hoisted)
    edst_ref: (TB, 1,  N)       per-key-node logit scalar     (hoisted)
    adj_ref : (TB, TQ, N)       adjacency in the caller's dtype
    h_ref   : (TB, N,  F_out_p) projected node features, zero-padded lanes
    o_ref   : (TB, TQ, F_out_p) lane-dense output block
    """
    TB, TQ, _ = esrc_ref.shape
    N = h_ref.shape[1]

    # Attention logits: broadcast add of the two hoisted scalars + ReLU (VPU).
    e = jnp.maximum(esrc_ref[...] + edst_ref[...], 0.0)            # (TB, TQ, N)

    # Adjacency mask + unnormalized softmax over the key axis (torch dim=2).
    att = jnp.where(adj_ref[...] > 0, e, jnp.float32(-9e15))
    att_max = jnp.max(att, axis=-1, keepdims=True)
    p = jnp.exp(att - att_max)
    denom = jnp.sum(p, axis=-1, keepdims=True)                     # >= 1, never 0

    # TODO(synk): F.dropout on the attention weights is omitted (eval-mode
    # semantics); training parity would need a pltpu.prng_random_bits mask.

    h = h_ref[...]
    if N <= 32:
        # Tiny graphs: contraction depth N << 128 wastes the MXU; do the
        # aggregation as N broadcast-multiply-accumulates on the VPU instead.
        out = p[:, :, 0:1] * h[:, 0:1, :]
        for j in range(1, N):                                      # static unroll
            out = out + p[:, :, j:j + 1] * h[:, j:j + 1, :]
    elif TB == 1:
        # Plain 2D dot gives the cleanest MXU lowering.
        out = jnp.dot(p[0], h[0], preferred_element_type=jnp.float32)[None]
    else:
        out = jnp.einsum("bqk,bko->bqo", p, h,
                         preferred_element_type=jnp.float32)

    # Denominator applied after the matmul: (TB,TQ,F) multiply, not (TB,TQ,N).
    out = out * pl.reciprocal(denom, approx=False)
    o_ref[...] = out.astype(o_ref.dtype)


def _vmem_budget_and_limit():
    """Derive a per-step working-set budget and the scoped-VMEM limit."""
    cap = 64 * 1024 * 1024                      # conservative default (v7x per-TC)
    try:
        cap = int(pltpu.get_tpu_info().vmem_capacity_bytes)
    except Exception:
        pass
    limit = min((cap * 3) // 4, 100 * 1024 * 1024)
    budget = (limit * 3) // 5                   # headroom for compiler temporaries
    return budget, limit


def _est_vmem_bytes(tb, tq, N, F_out_p):
    """Rough per-step VMEM use: double-buffered blocks + live f32 temporaries."""
    f32, db = 4, 2
    adj_blk = tb * tq * N * f32 * db
    h_blk = tb * N * F_out_p * f32 * db
    esrc_blk = tb * tq * f32 * db
    edst_blk = tb * N * f32 * db
    out_blk = tb * tq * F_out_p * f32 * db
    temps = tb * tq * N * f32 * 3               # e / masked / p slabs
    return adj_blk + h_blk + esrc_blk + edst_blk + out_blk + temps


def _pick_tiles(B, N, F_out_p, budget_bytes):
    # Pack several tiny graphs per step to fill MXU sublanes and amortize the
    # ~0.35us per-grid-step overhead; tb collapses to 1 for non-tiny graphs.
    tb = max(1, min(B, 512 // max(N, 1)))
    candidates = ([N] if N <= 1024 else []) + [512, 256, 128, 64, 32, 16, 8]
    for tq in candidates:
        tq = min(tq, N)
        if tq != N and tq % 8 != 0:             # (8,128) block constraint
            continue
        if _est_vmem_bytes(tb, tq, N, F_out_p) <= budget_bytes:
            return tb, tq
    return 1, min(N, 8)


def graph_attention_forward(x, adj, weight, weight2):
    """x: (B, N, F_in), adj: (B, N, N), weight: (F_in, F_out), weight2: (2*F_out, 1)."""
    B, N, F_in = x.shape
    F_out = weight.shape[1]
    F_out_p = _round_up(F_out, 128)             # lane-dense output stores

    # ---- Hoisted once-per-call work (plain XLA): projection + logit scalars.
    h = jnp.einsum("bnf,fo->bno", x, weight)                        # (B, N, F_out)
    a1 = weight2[:F_out, 0]
    a2 = weight2[F_out:, 0]
    e_src = jnp.einsum("bno,o->bn", h, a1)[..., None]               # (B, N, 1)
    e_dst = jnp.einsum("bno,o->bn", h, a2)[:, None, :]              # (B, 1, N)

    h_p = h if F_out_p == F_out else jnp.pad(
        h, ((0, 0), (0, 0), (0, F_out_p - F_out)))

    budget, vmem_limit = _vmem_budget_and_limit()
    tb, tq = _pick_tiles(B, N, F_out_p, budget)
    grid = (pl.cdiv(B, tb), pl.cdiv(N, tq))

    out_p = pl.pallas_call(
        gat_kernel,
        out_shape=jax.ShapeDtypeStruct((B, N, F_out_p), x.dtype),
        grid_spec=pltpu.PrefetchScalarGridSpec(
            num_scalar_prefetch=0,
            grid=grid,
            in_specs=[
                pl.BlockSpec((tb, tq, 1), lambda b, q: (b, q, 0)),       # e_src
                pl.BlockSpec((tb, 1, N), lambda b, q: (b, 0, 0)),        # e_dst
                pl.BlockSpec((tb, tq, N), lambda b, q: (b, q, 0)),       # adj
                pl.BlockSpec((tb, N, F_out_p), lambda b, q: (b, 0, 0)),  # h (padded)
            ],
            out_specs=pl.BlockSpec((tb, tq, F_out_p), lambda b, q: (b, q, 0)),
        ),
        compiler_params=pltpu.CompilerParams(
            # No cross-step scratch -> both axes independent -> both v7x TCs used.
            dimension_semantics=("parallel", "parallel"),
            vmem_limit_bytes=vmem_limit,
        ),
    )(e_src, e_dst, adj, h_p)

    return out_p if F_out_p == F_out else out_p[..., :F_out]


def reference_forward(x, adj, weight, weight2):
    """Pure-JAX replica of the PyTorch forward (eval mode) for validation."""
    B, N, _ = x.shape
    F_out = weight.shape[1]
    h = jnp.einsum("bnf,fo->bno", x, weight)
    hi = jnp.broadcast_to(h[:, :, None, :], (B, N, N, F_out))
    hj = jnp.broadcast_to(h[:, None, :, :], (B, N, N, F_out))
    attn_in = jnp.concatenate([hi, hj], axis=-1)               # (B, N, N, 2*F_out)
    e = jax.nn.relu(jnp.squeeze(attn_in @ weight2, axis=-1))   # (B, N, N)
    att = jnp.where(adj > 0, e, -9e15)
    att = jax.nn.softmax(att, axis=2)
    return jnp.einsum("bij,bjo->bio", att, h)


def _run_and_check(B, N, F_in, F_out, seed=0):
    key = jax.random.PRNGKey(seed)
    k_x, k_adj, k_w, k_w2 = jax.random.split(key, 4)

    # deterministic parameter init mirroring reset_parameters()
    stdv_w = 1.0 / math.sqrt(F_out)
    weight = jax.random.uniform(k_w, (F_in, F_out), jnp.float32,
                                minval=-stdv_w, maxval=stdv_w)
    stdv_w2 = 1.0 / math.sqrt(1.0)
    weight2 = jax.random.uniform(k_w2, (2 * F_out, 1), jnp.float32,
                                 minval=-stdv_w2, maxval=stdv_w2)

    x = jax.random.normal(k_x, (B, N, F_in), jnp.float32)
    adj = (jax.random.uniform(k_adj, (B, N, N)) > 0.5).astype(jnp.float32)
    adj = jnp.maximum(adj, jnp.eye(N, dtype=jnp.float32)[None, :, :])  # self-loops

    out = jax.block_until_ready(graph_attention_forward(x, adj, weight, weight2))
    ref = reference_forward(x, adj, weight, weight2)

    assert out.shape == (B, N, F_out)
    assert jnp.allclose(out, ref, atol=1e-4, rtol=1e-4), \
        f"mismatch vs reference at shape {(B, N, F_in, F_out)}"


if __name__ == "__main__":
    _run_and_check(2, 8, 16, 32)      # tiny-graph VPU-aggregation path, tb packing
    _run_and_check(4, 16, 8, 64)      # different F_out padding / batch-tiling path
    _run_and_check(2, 128, 32, 64)    # MXU aggregation path (N > 32)
    print("KERNEL_OK")
</pallas_src>

<mosaic_0001>
module attributes {stable_mosaic.version = 11 : i64} {
  func.func @gat_kernel(%arg0: i32, %arg1: i32, %arg2: memref<2x8x1xf32, #tpu.memory_space<vmem>>, %arg3: memref<2x1x8xf32, #tpu.memory_space<vmem>>, %arg4: memref<2x8x8xf32, #tpu.memory_space<vmem>>, %arg5: memref<2x8x128xf32, #tpu.memory_space<vmem>>, %arg6: memref<2x8x128xf32, #tpu.memory_space<vmem>>) attributes {dimension_semantics = [#tpu.dimension_semantics<parallel>, #tpu.dimension_semantics<parallel>], iteration_bounds = array<i64: 1, 1>, scalar_prefetch = 0 : i64, scratch_operands = 0 : i64, tpu.core_type = #tpu.core_type<tc>, window_params = [{transform_indices = @transform_0, window_bounds = array<i64: 2, 8, 1>}, {transform_indices = @transform_1, window_bounds = array<i64: 2, 1, 8>}, {transform_indices = @transform_2, window_bounds = array<i64: 2, 8, 8>}, {transform_indices = @transform_3, window_bounds = array<i64: 2, 8, 128>}, {transform_indices = @transform_4, window_bounds = array<i64: 2, 8, 128>}]} {
    %c0 = arith.constant 0 : index
    %c0_0 = arith.constant 0 : index
    %c0_1 = arith.constant 0 : index
    %0 = vector.load %arg2[%c0, %c0_0, %c0_1] : memref<2x8x1xf32, #tpu.memory_space<vmem>>, vector<2x8x1xf32>
    %c0_2 = arith.constant 0 : index
    %c0_3 = arith.constant 0 : index
    %c0_4 = arith.constant 0 : index
    %1 = vector.load %arg3[%c0_2, %c0_3, %c0_4] : memref<2x1x8xf32, #tpu.memory_space<vmem>>, vector<2x1x8xf32>
    %2 = vector.broadcast %0 : vector<2x8x1xf32> to vector<2x8x8xf32>
    %3 = vector.broadcast %1 : vector<2x1x8xf32> to vector<2x8x8xf32>
    %4 = arith.addf %2, %3 : vector<2x8x8xf32>
    %cst = arith.constant 0.000000e+00 : f32
    %5 = vector.broadcast %cst : f32 to vector<2x8x8xf32>
    %6 = arith.maximumf %4, %5 : vector<2x8x8xf32>
    %c0_5 = arith.constant 0 : index
    %c0_6 = arith.constant 0 : index
    %c0_7 = arith.constant 0 : index
    %7 = vector.load %arg4[%c0_5, %c0_6, %c0_7] : memref<2x8x8xf32, #tpu.memory_space<vmem>>, vector<2x8x8xf32>
    %cst_8 = arith.constant 0.000000e+00 : f32
    %8 = vector.broadcast %cst_8 : f32 to vector<2x8x8xf32>
    %9 = arith.cmpf ogt, %7, %8 : vector<2x8x8xf32>
    %cst_9 = arith.constant -9.000000e+15 : f32
    %10 = vector.broadcast %cst_9 : f32 to vector<2x8x8xf32>
    %11 = arith.select %9, %6, %10 : vector<2x8x8xi1>, vector<2x8x8xf32>
    %cst_10 = arith.constant dense<0xFF800000> : vector<2x8xf32>
    %12 = vector.multi_reduction <maximumf>, %11, %cst_10 [2] : vector<2x8x8xf32> to vector<2x8xf32>
    %13 = vector.shape_cast %12 : vector<2x8xf32> to vector<2x8x1xf32>
    %14 = vector.broadcast %13 : vector<2x8x1xf32> to vector<2x8x8xf32>
    %15 = arith.subf %11, %14 : vector<2x8x8xf32>
    %16 = math.exp %15 : vector<2x8x8xf32>
    %cst_11 = arith.constant dense<0.000000e+00> : vector<2x8xf32>
    %17 = vector.multi_reduction <add>, %16, %cst_11 [2] : vector<2x8x8xf32> to vector<2x8xf32>
    %18 = vector.shape_cast %17 : vector<2x8xf32> to vector<2x8x1xf32>
    %c0_12 = arith.constant 0 : index
    %c0_13 = arith.constant 0 : index
    %c0_14 = arith.constant 0 : index
    %19 = vector.load %arg5[%c0_12, %c0_13, %c0_14] : memref<2x8x128xf32, #tpu.memory_space<vmem>>, vector<2x8x128xf32>
    %20 = vector.extract_strided_slice %16 {offsets = [0, 0, 0], sizes = [2, 8, 1], strides = [1, 1, 1]} : vector<2x8x8xf32> to vector<2x8x1xf32>
    %21 = vector.extract_strided_slice %19 {offsets = [0, 0, 0], sizes = [2, 1, 128], strides = [1, 1, 1]} : vector<2x8x128xf32> to vector<2x1x128xf32>
    %22 = vector.broadcast %20 : vector<2x8x1xf32> to vector<2x8x128xf32>
    %23 = vector.broadcast %21 : vector<2x1x128xf32> to vector<2x8x128xf32>
    %24 = arith.mulf %22, %23 : vector<2x8x128xf32>
    %25 = vector.extract_strided_slice %16 {offsets = [0, 0, 1], sizes = [2, 8, 1], strides = [1, 1, 1]} : vector<2x8x8xf32> to vector<2x8x1xf32>
    %26 = vector.extract_strided_slice %19 {offsets = [0, 1, 0], sizes = [2, 1, 128], strides = [1, 1, 1]} : vector<2x8x128xf32> to vector<2x1x128xf32>
    %27 = vector.broadcast %25 : vector<2x8x1xf32> to vector<2x8x128xf32>
    %28 = vector.broadcast %26 : vector<2x1x128xf32> to vector<2x8x128xf32>
    %29 = arith.mulf %27, %28 : vector<2x8x128xf32>
    %30 = arith.addf %24, %29 : vector<2x8x128xf32>
    %31 = vector.extract_strided_slice %16 {offsets = [0, 0, 2], sizes = [2, 8, 1], strides = [1, 1, 1]} : vector<2x8x8xf32> to vector<2x8x1xf32>
    %32 = vector.extract_strided_slice %19 {offsets = [0, 2, 0], sizes = [2, 1, 128], strides = [1, 1, 1]} : vector<2x8x128xf32> to vector<2x1x128xf32>
    %33 = vector.broadcast %31 : vector<2x8x1xf32> to vector<2x8x128xf32>
    %34 = vector.broadcast %32 : vector<2x1x128xf32> to vector<2x8x128xf32>
    %35 = arith.mulf %33, %34 : vector<2x8x128xf32>
    %36 = arith.addf %30, %35 : vector<2x8x128xf32>
    %37 = vector.extract_strided_slice %16 {offsets = [0, 0, 3], sizes = [2, 8, 1], strides = [1, 1, 1]} : vector<2x8x8xf32> to vector<2x8x1xf32>
    %38 = vector.extract_strided_slice %19 {offsets = [0, 3, 0], sizes = [2, 1, 128], strides = [1, 1, 1]} : vector<2x8x128xf32> to vector<2x1x128xf32>
    %39 = vector.broadcast %37 : vector<2x8x1xf32> to vector<2x8x128xf32>
    %40 = vector.broadcast %38 : vector<2x1x128xf32> to vector<2x8x128xf32>
    %41 = arith.mulf %39, %40 : vector<2x8x128xf32>
    %42 = arith.addf %36, %41 : vector<2x8x128xf32>
    %43 = vector.extract_strided_slice %16 {offsets = [0, 0, 4], sizes = [2, 8, 1], strides = [1, 1, 1]} : vector<2x8x8xf32> to vector<2x8x1xf32>
    %44 = vector.extract_strided_slice %19 {offsets = [0, 4, 0], sizes = [2, 1, 128], strides = [1, 1, 1]} : vector<2x8x128xf32> to vector<2x1x128xf32>
    %45 = vector.broadcast %43 : vector<2x8x1xf32> to vector<2x8x128xf32>
    %46 = vector.broadcast %44 : vector<2x1x128xf32> to vector<2x8x128xf32>
    %47 = arith.mulf %45, %46 : vector<2x8x128xf32>
    %48 = arith.addf %42, %47 : vector<2x8x128xf32>
    %49 = vector.extract_strided_slice %16 {offsets = [0, 0, 5], sizes = [2, 8, 1], strides = [1, 1, 1]} : vector<2x8x8xf32> to vector<2x8x1xf32>
    %50 = vector.extract_strided_slice %19 {offsets = [0, 5, 0], sizes = [2, 1, 128], strides = [1, 1, 1]} : vector<2x8x128xf32> to vector<2x1x128xf32>
    %51 = vector.broadcast %49 : vector<2x8x1xf32> to vector<2x8x128xf32>
    %52 = vector.broadcast %50 : vector<2x1x128xf32> to vector<2x8x128xf32>
    %53 = arith.mulf %51, %52 : vector<2x8x128xf32>
    %54 = arith.addf %48, %53 : vector<2x8x128xf32>
    %55 = vector.extract_strided_slice %16 {offsets = [0, 0, 6], sizes = [2, 8, 1], strides = [1, 1, 1]} : vector<2x8x8xf32> to vector<2x8x1xf32>
    %56 = vector.extract_strided_slice %19 {offsets = [0, 6, 0], sizes = [2, 1, 128], strides = [1, 1, 1]} : vector<2x8x128xf32> to vector<2x1x128xf32>
    %57 = vector.broadcast %55 : vector<2x8x1xf32> to vector<2x8x128xf32>
    %58 = vector.broadcast %56 : vector<2x1x128xf32> to vector<2x8x128xf32>
    %59 = arith.mulf %57, %58 : vector<2x8x128xf32>
    %60 = arith.addf %54, %59 : vector<2x8x128xf32>
    %61 = vector.extract_strided_slice %16 {offsets = [0, 0, 7], sizes = [2, 8, 1], strides = [1, 1, 1]} : vector<2x8x8xf32> to vector<2x8x1xf32>
    %62 = vector.extract_strided_slice %19 {offsets = [0, 7, 0], sizes = [2, 1, 128], strides = [1, 1, 1]} : vector<2x8x128xf32> to vector<2x1x128xf32>
    %63 = vector.broadcast %61 : vector<2x8x1xf32> to vector<2x8x128xf32>
    %64 = vector.broadcast %62 : vector<2x1x128xf32> to vector<2x8x128xf32>
    %65 = arith.mulf %63, %64 : vector<2x8x128xf32>
    %66 = arith.addf %60, %65 : vector<2x8x128xf32>
    %67 = tpu.reciprocal %18 : vector<2x8x1xf32> -> vector<2x8x1xf32>
    %68 = vector.broadcast %67 : vector<2x8x1xf32> to vector<2x8x128xf32>
    %69 = arith.mulf %66, %68 : vector<2x8x128xf32>
    %c0_15 = arith.constant 0 : index
    %c0_16 = arith.constant 0 : index
    %c0_17 = arith.constant 0 : index
    %70 = vector.load %arg6[%c0_15, %c0_16, %c0_17] : memref<2x8x128xf32, #tpu.memory_space<vmem>>, vector<2x8x128xf32>
    tpu.vector_store %arg6[%c0_15, %c0_16, %c0_17], %69 {strides = array<i32>} : memref<2x8x128xf32, #tpu.memory_space<vmem>>, vector<2x8x128xf32>,
    return
  }
  func.func @transform_0(%arg0: i32, %arg1: i32) -> (i32, i32, i32) {
    %c0_i32 = arith.constant 0 : i32
    %c0_i32_0 = arith.constant 0 : i32
    return %arg0, %arg1, %c0_i32 : i32, i32, i32
  }
  func.func @transform_1(%arg0: i32, %arg1: i32) -> (i32, i32, i32) {
    %c0_i32 = arith.constant 0 : i32
    %c0_i32_0 = arith.constant 0 : i32
    %c0_i32_1 = arith.constant 0 : i32
    return %arg0, %c0_i32, %c0_i32_0 : i32, i32, i32
  }
  func.func @transform_2(%arg0: i32, %arg1: i32) -> (i32, i32, i32) {
    %c0_i32 = arith.constant 0 : i32
    %c0_i32_0 = arith.constant 0 : i32
    return %arg0, %arg1, %c0_i32 : i32, i32, i32
  }
  func.func @transform_3(%arg0: i32, %arg1: i32) -> (i32, i32, i32) {
    %c0_i32 = arith.constant 0 : i32
    %c0_i32_0 = arith.constant 0 : i32
    %c0_i32_1 = arith.constant 0 : i32
    return %arg0, %c0_i32, %c0_i32_0 : i32, i32, i32
  }
  func.func @transform_4(%arg0: i32, %arg1: i32) -> (i32, i32, i32) {
    %c0_i32 = arith.constant 0 : i32
    %c0_i32_0 = arith.constant 0 : i32
    return %arg0, %arg1, %c0_i32 : i32, i32, i32
  }
}

</mosaic_0001>

<bundles_post_ra>
// kernel: tpu_custom_call.1
= control target key start
LH: loop header
LB: loop body
LE: loop exit
PB: predicated region body
PF: predicated region fallthrough
CT: control target
= control target key end

     0   :  { %9 = vsyncpa [#allocation3], 0  ;;  %s462_s0 = inlined_call_operand.vmem [shape: f32[2,8,1], index: 0, kind: input, shape index: {}]   ;;  %s463_s1 = inlined_call_operand.vmem [shape: f32[2,1,8], index: 1, kind: input, shape index: {}]   ;;  %s464_s2 = inlined_call_operand.vmem [shape: f32[2,8,8], index: 2, kind: input, shape index: {}]   ;;  %s465_s3 = inlined_call_operand.hbm [shape: f32[2,8,128], index: 3, kind: input, shape index: {}]   ;;  %s466_s4 = inlined_call_operand.hbm [shape: f32[2,8,128], index: 4, kind: output, shape index: {}]  }
   0x1   :  { %10 = vsyncpa [#allocation4], 0  ;;  %s353_s15 = smov [#allocation2]   ;;  %s305_s19 = scalar_lea.hbm %s465_s3, 256 }
   0x2   :  { %s22_s16 = sshll.u32 %s353_s15, 4  ;;  %p306_p0 = scmp.ne.s32.totalorder %s465_s3, %s305_s19  ;;  %s23_s16 = int_to_ptr.vmem [resolvable:$true] %s22_s16 }
   0x3   :  { %p309_p1 = scmp.lt.u32.totalorder %s305_s19, %s465_s3 }
   0x5   :  { %p311_p2 = pnand %p309_p1, %p306_p0 }
   0x7   :  { %314 = shalt.err (!%p311_p2)
}
   0x8   :  { %s315_s24 = scalar_lea.vmem %s23_s16, 256  ;;  %p320_p4 = scmp.lt.s32.totalorder %s23_s16, %s23_s16 }
   0x9   :  { %p316_p3 = scmp.ne.s32.totalorder %s23_s16, %s315_s24  ;;  %p321_p5 = scmp.lt.s32.totalorder %s315_s24, %s315_s24 }
   0xb   :  { %p322_p6 = por %p321_p5, %p320_p4 }
   0xd   :  { %p323_p7 = pnand %p322_p6, %p316_p3 }
   0xf   :  { %326 = shalt.err (!%p323_p7)
}
  0x10   :  { %s354_s25 = smov 128   ;;  %s355_s26 = smov 8  }
  0x11   :  { %28 = dma.hbm_to_vmem [thread:$0]  %s465_s3, 256, %s23_s16, [#allocation3], %s354_s25, %s354_s25, %s355_s26  }
  0x12   :  { %349 = dma.done.wait [#allocation3], 256  }
  0x13   :  { %350 = vsyncadd [#allocation3], 4294967040  ;;  %v356_v0 = vmov 0   ;;  %v32_v1 = vld [vmem:[%s462_s0] sm:$0xff]  ;;  %v33_v2 = vld [vmem:[%s462_s0 + $0x8] sm:$0xff]  ;;  %vm68_vm1 = vcmask 64512   ;;  %v99_v34 = vlaneseq }
  0x14   :  { %286 = vset.pattern.permute.xlu0 %v356_v0  ;;  %287 = vset.pattern.permute.xlu1 %v356_v0  ;;  %v272_v3 = vld [vmem:[%s463_s1] ss:$0 sm:$0xff]  ;;  %v273_v7 = vld [vmem:[%s463_s1 + $0x1] ss:$0 sm:$0xff]  ;;  %v63_v9 = vld [vmem:[%s464_s2 + $0x8] sm:$0xff]  ;;  %v357_v17 = vmov 2  }
  0x15   :  { %38 = vperm.xlu0 %286, %v32_v1   ;;  %v62_v4 = vld [vmem:[%s464_s2] sm:$0xff]  ;;  %vm65_vm2 = vcmp.gt.f32.partialorder %v63_v9, 0.0  ;;  %v358_v27 = vmov 1   ;;  %v359_v28 = vmov 3   ;;  %v360_v29 = vmov 7   ;;  %v429_v38 = vld [vmem:[#allocation2 + $0x8] sm:$0xff] }
  0x16   :  { %vm64_vm0 = vcmp.gt.f32.partialorder %v62_v4, 0.0  ;;  %v361_v30 = vmov 4   ;;  %v362_v31 = vmov 5   ;;  %v363_v32 = vmov 6   ;;  %v87_v0 = vld [vmem:[#allocation2] sm:$0xff]  ;;  %s364_s1 = smov [#allocation5]  }
  0x17   :  { %v427_v36 = vshrl.u32 %v99_v34, 7  ;;  %s260_s2 = sshll.u32 %s364_s1, 4  ;;  %s261_s2 = int_to_ptr.vmem [resolvable:$true] %s260_s2 }
  0x18   :  { %s327_s13 = scalar_lea.vmem %s261_s2, 256  ;;  %p332_p9 = scmp.lt.s32.totalorder %s261_s2, %s261_s2 }
  0x19   :  { %43 = vperm.xlu0 %286, %v33_v2   ;;  %v101_v39 = vsub.s32 0, %v427_v36  ;;  %v119_v40 = vsub.s32 1, %v427_v36  ;;  %v139_v44 = vsub.s32 2, %v427_v36  ;;  %v159_v53 = vsub.s32 3, %v427_v36  ;;  %p328_p8 = scmp.ne.s32.totalorder %s261_s2, %s327_s13  ;;  %p333_p10 = scmp.lt.s32.totalorder %s327_s13, %s327_s13 }
  0x1a   :  { %v179_v59 = vsub.s32 4, %v427_v36  ;;  %v199_v4 = vsub.s32 5, %v427_v36 }
  0x1b   :  { %v106_v42 = vrot.slane %v429_v38, %v101_v39  ;;  %v124_v43 = vrot.slane %v429_v38, %v119_v40  ;;  %v144_v48 = vrot.slane %v429_v38, %v139_v44  ;;  %v164_v55 = vrot.slane %v429_v38, %v159_v53  ;;  %p334_p11 = por %p333_p10, %p332_p9 }
  0x1c   :  { %v184_v61 = vrot.slane %v429_v38, %v179_v59 }
  0x1d   :  { %289 = vset.pattern.permute.xlu0 %v357_v17  ;;  %p335_p12 = pnand %p334_p11, %p328_p8 }
  0x94   :  { %v39_v5 = vpop.permute.xlu0 %38 }
  0x95   :  { %v58_v6 = vadd.f32 %v272_v3, %v39_v5  ;;  %v120_v3 = vrot.slane %v87_v0, %v119_v40 }
  0x97   :  { %v60_v8 = vmax.f32 %v58_v6, 0.0  ;;  %v102_v6 = vrot.slane %v87_v0, %v101_v39 }
  0x98   :  { %v44_v10 = vpop.permute.xlu0 %43 }
  0x99   :  { %v59_v11 = vadd.f32 %v273_v7, %v44_v10  ;;  %v66_v12 = vsel %vm64_vm0, %v60_v8, -9e+15  ;;  %v140_v7 = vrot.slane %v87_v0, %v139_v44  ;;  %v204_v8 = vrot.slane %v429_v38, %v199_v4 }
  0x9a   :  { %v69_v13 = vsel %vm68_vm1, %v66_v12, -inf }
  0x9b   :  { %v61_v14 = vmax.f32 %v59_v11, 0.0  ;;  %70 = vmax.xlane.f32.xlu1 %v69_v13 }
  0x9d   :  { %v67_v15 = vsel %vm65_vm2, %v61_v14, -9e+15 }
  0x9e   :  { %v72_v16 = vsel %vm68_vm1, %v67_v15, -inf }
  0x9f   :  { %73 = vmax.xlane.f32.xlu1 %v72_v16 }
 0x128   :  { %v71_v18 = vpop.xlane.xlu1 %70 }
 0x129   :  { %v75_v19 = vsub.f32 %v66_v12, %v71_v18 }
 0x12b   :  { %v77_v20 = vmul.f32 1.442695, %v75_v19  ;;  %v219_v19 = vsub.s32 6, %v427_v36 }
 0x12c   :  { %v74_v21 = vpop.xlane.xlu1 %73 }
 0x12d   :  { %297 = vpow2.f32 %v77_v20  ;;  %v76_v22 = vsub.f32 %v67_v15, %v74_v21  ;;  %v160_v15 = vrot.slane %v87_v0, %v159_v53  ;;  %v200_v21 = vrot.slane %v87_v0, %v199_v4 }
 0x12f   :  { %v79_v23 = vmul.f32 1.442695, %v76_v22 }
 0x131   :  { %299 = vpow2.f32 %v79_v23 }
 0x137   :  { %v298_v24 = vpop.eup %297 }
 0x138   :  { %91 = vperm.xlu1 %287, %v298_v24   ;;  %v81_v25 = vsel %vm68_vm1, %v298_v24, 0.0 }
 0x139   :  { %82 = vadd.xlane.f32.xlu0 %v81_v25  ;;  %v220_v25 = vrot.slane %v87_v0, %v219_v19 }
 0x13b   :  { %v300_v26 = vpop.eup %299 }
 0x13c   :  { %96 = vperm.xlu1 %287, %v300_v26   ;;  %v84_v33 = vsel %vm68_vm1, %v300_v26, 0.0 }
 0x140   :  { %288 = vset.pattern.permute.xlu1 %v358_v27 }
 0x141   :  { %110 = vperm.xlu1 %288, %v298_v24  }
 0x145   :  { %114 = vperm.xlu1 %288, %v300_v26  }
 0x149   :  { %290 = vset.pattern.permute.xlu1 %v357_v17  ;;  %v180_v17 = vrot.slane %v87_v0, %v179_v59 }
 0x14a   :  { %134 = vperm.xlu1 %290, %v300_v26  }
 0x14e   :  { %291 = vset.pattern.permute.xlu1 %v359_v28 }
 0x14f   :  { %130 = vperm.xlu0 %289, %v298_v24   ;;  %150 = vperm.xlu1 %291, %v298_v24  }
 0x153   :  { %154 = vperm.xlu1 %291, %v300_v26   ;;  %296 = vset.pattern.permute.xlu0 %v360_v29 }
 0x157   :  { %292 = vset.pattern.permute.xlu1 %v361_v30 }
 0x158   :  { %170 = vperm.xlu1 %292, %v298_v24  }
 0x15c   :  { %174 = vperm.xlu1 %292, %v300_v26  }
 0x160   :  { %293 = vset.pattern.permute.xlu1 %v362_v31 }
 0x161   :  { %190 = vperm.xlu1 %293, %v298_v24  }
 0x165   :  { %194 = vperm.xlu1 %293, %v300_v26  }
 0x169   :  { %294 = vset.pattern.permute.xlu1 %v363_v32 }
 0x16a   :  { %210 = vperm.xlu1 %294, %v298_v24  }
 0x16e   :  { %214 = vperm.xlu1 %294, %v300_v26  }
 0x172   :  { %295 = vset.pattern.permute.xlu1 %v360_v29 }
 0x173   :  { %230 = vperm.xlu1 %295, %v298_v24  }
 0x197   :  { %85 = vadd.xlane.f32.xlu1 %v84_v33 }
 0x1a8   :  { %234 = vperm.xlu1 %295, %v300_v26   ;;  %v239_v26 = vsub.s32 7, %v427_v36 }
 0x1aa   :  { %v240_v32 = vrot.slane %v87_v0, %v239_v26  ;;  %v244_v36 = vrot.slane %v429_v38, %v239_v26 }
 0x1b7   :  { %v92_v35 = vpop.permute.xlu1 %91 }
 0x1b8   :  { %v107_v12 = vmul.f32 %v102_v6, %v92_v35 }
 0x1bb   :  { %v97_v37 = vpop.permute.xlu1 %96 }
 0x1bc   :  { %v108_v46 = vmul.f32 %v106_v42, %v97_v37  ;;  %v224_v42 = vrot.slane %v429_v38, %v219_v19 }
 0x1c0   :  { %v111_v41 = vpop.permute.xlu1 %110 }
 0x1c1   :  { %v125_v10 = vmul.f32 %v120_v3, %v111_v41 }
 0x1c3   :  { %v127_v16 = vadd.f32 %v125_v10, %v107_v12 }
 0x1c4   :  { %v115_v45 = vpop.permute.xlu1 %114 }
 0x1c5   :  { %v126_v47 = vmul.f32 %v124_v43, %v115_v45 }
 0x1c6   :  { %v83_v1 = vpop.xlane.xlu0 %82 }
 0x1c7   :  { %v128_v49 = vadd.f32 %v126_v47, %v108_v46  ;;  %301 = vrcp.f32 %v83_v1 }
 0x1c9   :  { %v135_v50 = vpop.permute.xlu1 %134 }
 0x1ca   :  { %v146_v51 = vmul.f32 %v144_v48, %v135_v50 }
 0x1cc   :  { %v148_v52 = vadd.f32 %v146_v51, %v128_v49 }
 0x1ce   :  { %v151_v54 = vpop.permute.xlu1 %150  ;;  %v131_v9 = vpop.permute.xlu0 %130 }
 0x1cf   :  { %v145_v13 = vmul.f32 %v140_v7, %v131_v9  ;;  %v165_v23 = vmul.f32 %v160_v15, %v151_v54 }
 0x1d1   :  { %v147_v20 = vadd.f32 %v145_v13, %v127_v16  ;;  %v302_v40 = vpop.eup %301 }
 0x1d2   :  { %v155_v56 = vpop.permute.xlu1 %154 }
 0x1d3   :  { %v166_v57 = vmul.f32 %v164_v55, %v155_v56  ;;  %v167_v27 = vadd.f32 %v165_v23, %v147_v20 }
 0x1d5   :  { %v168_v58 = vadd.f32 %v166_v57, %v148_v52 }
 0x1d7   :  { %v171_v60 = vpop.permute.xlu1 %170 }
 0x1d8   :  { %v185_v24 = vmul.f32 %v180_v17, %v171_v60 }
 0x1da   :  { %v187_v30 = vadd.f32 %v185_v24, %v167_v27 }
 0x1db   :  { %v175_v62 = vpop.permute.xlu1 %174 }
 0x1dc   :  { %v186_v63 = vmul.f32 %v184_v61, %v175_v62 }
 0x1de   :  { %v188_v2 = vadd.f32 %v186_v63, %v168_v58 }
 0x1e0   :  { %v191_v5 = vpop.permute.xlu1 %190 }
 0x1e1   :  { %v205_v28 = vmul.f32 %v200_v21, %v191_v5 }
 0x1e3   :  { %v207_v33 = vadd.f32 %v205_v28, %v187_v30 }
 0x1e4   :  { %v195_v11 = vpop.permute.xlu1 %194 }
 0x1e5   :  { %v206_v14 = vmul.f32 %v204_v8, %v195_v11 }
 0x1e7   :  { %v208_v18 = vadd.f32 %v206_v14, %v188_v2 }
 0x1e9   :  { %v211_v22 = vpop.permute.xlu1 %210 }
 0x1ea   :  { %v225_v31 = vmul.f32 %v220_v25, %v211_v22 }
 0x1ec   :  { %v227_v35 = vadd.f32 %v225_v31, %v207_v33 }
 0x1ed   :  { %v215_v29 = vpop.permute.xlu1 %214 }
 0x1ee   :  { %v226_v44 = vmul.f32 %v224_v42, %v215_v29 }
 0x1f0   :  { %v228_v47 = vadd.f32 %v226_v44, %v208_v18 }
 0x1f2   :  { %v231_v34 = vpop.permute.xlu1 %230 }
 0x1f3   :  { %v245_v37 = vmul.f32 %v240_v32, %v231_v34 }
 0x1f5   :  { %v247_v39 = vadd.f32 %v245_v37, %v227_v35 }
 0x1f7   :  { %v251_v41 = vmul.f32 %v302_v40, %v247_v39 }
 0x1f9   :  { %253 = vst [vmem:[#allocation5] sm:$0xff] %v251_v41 }
 0x224   :  { %v86_v43 = vpop.xlane.xlu1 %85 }
 0x225   :  { %303 = vrcp.f32 %v86_v43 }
 0x228   :  { %v235_v45 = vpop.permute.xlu1 %234 }
 0x229   :  { %v246_v46 = vmul.f32 %v244_v36, %v235_v45 }
 0x22b   :  { %v248_v48 = vadd.f32 %v246_v46, %v228_v47 }
 0x22f   :  { %v304_v49 = vpop.eup %303 }
 0x230   :  { %v252_v50 = vmul.f32 %v304_v49, %v248_v48 }
 0x232   :  { %254 = vst [vmem:[#allocation5 + $0x8] sm:$0xff] %v252_v50 }
 0x233   :  { %338 = shalt.err (!%p335_p12)
}
 0x234   :  { %s339_s16 = scalar_lea.hbm %s466_s4, 256 }
 0x235   :  { %p340_p13 = scmp.ne.s32.totalorder %s466_s4, %s339_s16  ;;  %p343_p0 = scmp.lt.u32.totalorder %s339_s16, %s466_s4 }
 0x237   :  { %p345_p1 = pnand %p343_p0, %p340_p13 }
 0x239   :  { %348 = shalt.err (!%p345_p1)
}
 0x23a   :  { %266 = dma.vmem_to_hbm [thread:$0]  %s261_s2, 256, %s466_s4, [#allocation4], %s354_s25, %s354_s25, %s355_s26  }
 0x23b   :  { %351 = dma.done.wait [#allocation4], 256  }
 0x23c   :  { %352 = vsyncadd [#allocation4], 4294967040 }
 0x23d   :  { %270 = vsyncpa [#allocation3], 1 }
 0x23e   :  { %271 = vsyncpa [#allocation4], 1 }

</bundles_post_ra>
